<compile_context>
chip_gen: v6e
topology: v6e:2x2x1
jax: 0.10.0
libtpu: 0.0.40
codegen_flags: <defaults>
</compile_context>

<pallas_src>
import functools

import jax
import jax.numpy as jnp
from jax.experimental import pallas as pl
from jax.experimental.pallas import tpu as pltpu

_INV_SQRT2 = 0.7071067811865476        # 1/sqrt(2)
_SQRT_2_OVER_PI = 0.7978845608028654   # sqrt(2/pi) for tanh-GELU


def _mlp_kernel(x_ref, w1_ref, b1_ref, w2_ref, b2_ref, g_ref, beta_ref,
                o_ref, acc_ref, *, eps, approximate_gelu):
    # Grid = (row blocks [parallel], hidden blocks [arbitrary, reduction]).
    #   x_ref  (TM, D_in)        w1_ref (D_in, HT)    b1_ref (1, HT)      [f32]
    #   w2_ref (HT, D_out)       b2_ref/g/beta (1, D_out)                 [f32]
    #   o_ref  (TM, D_out)       acc_ref (TM, D_out) f32 scratch
    k = pl.program_id(1)

    @pl.when(k == 0)
    def _():
        acc_ref[...] = jnp.zeros_like(acc_ref)

    # ---- fc1 on this hidden tile (MXU, f32 accumulation) ----
    h = jnp.dot(x_ref[...], w1_ref[...],
                preferred_element_type=jnp.float32) + b1_ref[...]

    # ---- GELU (elementwise -> valid per hidden tile), f32 math ----
    if approximate_gelu:
        # tanh form uses the EUP slot; numerics differ slightly from exact erf.
        h = 0.5 * h * (1.0 + jnp.tanh(_SQRT_2_OVER_PI * (h + 0.044715 * h * h * h)))
    else:
        h = 0.5 * h * (1.0 + jax.lax.erf(h * _INV_SQRT2))

    # ---- fc2 partial product accumulated over hidden tiles ----
    acc_ref[...] += jnp.dot(h.astype(w2_ref.dtype), w2_ref[...],
                            preferred_element_type=jnp.float32)

    # ---- finalize: bias + LayerNorm (eps, affine) over last axis, f32 math ----
    @pl.when(k == pl.num_programs(1) - 1)
    def _():
        y = acc_ref[...] + b2_ref[...]
        mean = jnp.mean(y, axis=-1, keepdims=True)
        yc = y - mean
        var = jnp.mean(yc * yc, axis=-1, keepdims=True)
        inv = jax.lax.rsqrt(var + eps)
        o_ref[...] = (yc * inv * g_ref[...] + beta_ref[...]).astype(o_ref.dtype)


def _round_up(v, m):
    return ((v + m - 1) // m) * m


def _vmem_capacity_bytes():
    try:
        return int(pltpu.get_tpu_info().vmem_capacity_bytes)
    except Exception:
        return 64 * 2**20  # conservative: v7x per-TC VMEM


def _bspec(shape, index_map, buffers=None):
    """BlockSpec with optional explicit buffer count (single-buffer constants)."""
    if buffers is None:
        return pl.BlockSpec(shape, index_map)
    try:
        return pl.BlockSpec(shape, index_map, pipeline_mode=pl.Buffered(buffers))
    except TypeError:  # older jax without pipeline_mode kwarg
        return pl.BlockSpec(shape, index_map)


def mlp_pallas(x, w1, b1, w2, b2, gamma, beta, *, eps=1e-6, block_rows=512,
               hidden_block=None, compute_dtype=None, approximate_gelu=False):
    """x: (..., in_features) -> (..., out_features)."""
    orig_shape = x.shape
    d_in, hidden = w1.shape
    d_out = w2.shape[1]

    if compute_dtype is None:
        compute_dtype = x.dtype  # pass jnp.bfloat16 for the fast MXU path (numerics drift)
    compute_dtype = jnp.dtype(compute_dtype)
    out_dtype = x.dtype

    x2 = x.reshape(-1, d_in).astype(compute_dtype)
    n = x2.shape[0]

    c_item = compute_dtype.itemsize
    o_item = jnp.dtype(out_dtype).itemsize

    # ---- row tile: sublane packing of the compute dtype, 256-aligned when possible ----
    packing = max(8, 32 // c_item)          # 8 f32 / 16 bf16 / 32 int8
    n_pad = _round_up(n, packing)
    align = 256 if n_pad >= 256 else packing
    block_m = max(packing, min(_round_up(block_rows, align), _round_up(n_pad, align)))

    # ---- hidden-tile candidates: divisors of `hidden`, 128-aligned, largest first ----
    if hidden_block is not None:
        assert hidden % hidden_block == 0, "hidden_block must divide hidden_features"
        h_candidates = [int(hidden_block)]
    else:
        h_candidates = [hidden]
        t = 4096
        while t >= 128:
            if t < hidden and hidden % t == 0:
                h_candidates.append(t)
            t //= 2

    capacity = _vmem_capacity_bytes()
    budget = int(0.85 * capacity)  # leave headroom for Mosaic internal scratch

    def vmem_estimate(bm, ht, nh):
        wbuf = 1 if nh == 1 else 2  # resident (single-buffered) vs streamed weight tiles
        return (2 * bm * d_in * c_item                      # x tiles (double-buffered)
                + 2 * bm * d_out * o_item                   # output tiles
                + wbuf * (d_in * ht + ht * d_out) * c_item  # w1 / w2 tiles
                + wbuf * ht * 4                             # b1 tile
                + 3 * d_out * 4                             # b2 / gamma / beta (single-buffered)
                + bm * d_out * 4                            # f32 accumulator scratch
                + bm * ht * 4)                              # f32 hidden intermediate

    # Prefer shrinking the hidden tile (stream weights) before shrinking block_m.
    h_tile = None
    num_h = None
    bm = block_m
    while h_tile is None:
        for ht in h_candidates:
            if vmem_estimate(bm, ht, hidden // ht) <= budget:
                h_tile, num_h = ht, hidden // ht
                break
        if h_tile is None:
            if bm <= packing:
                h_tile = h_candidates[-1]
                num_h = hidden // h_tile
            else:
                bm = max(packing, _round_up(bm // 2, packing))
    block_m = bm

    grid = (pl.cdiv(n, block_m), num_h)  # last row block overhangs; OOB writes clipped

    w1c = w1.astype(compute_dtype)
    w2c = w2.astype(compute_dtype)
    # Biases / LayerNorm params stay f32 (applied after f32 accumulation).
    b1r = b1.reshape(1, hidden).astype(jnp.float32)
    b2r = b2.reshape(1, d_out).astype(jnp.float32)
    gr = gamma.reshape(1, d_out).astype(jnp.float32)
    br = beta.reshape(1, d_out).astype(jnp.float32)

    est = vmem_estimate(block_m, h_tile, num_h)
    vmem_limit = int(min(capacity, max(budget, int(est * 1.25))))

    cost = pl.CostEstimate(
        flops=2 * n * (d_in * hidden + hidden * d_out),
        transcendentals=n * hidden + n,  # gelu per hidden activation + rsqrt per row
        bytes_accessed=(n * d_in * c_item
                        + (d_in * hidden + hidden * d_out) * c_item
                        + (hidden + 3 * d_out) * 4
                        + n * d_out * o_item),
    )

    # When the whole hidden dim is resident (num_h == 1) the weight index_maps are
    # constant -> single-buffer them; when streaming, keep default double-buffering.
    wbufs = 1 if num_h == 1 else None

    in_specs = [
        _bspec((block_m, d_in), lambda i, k: (i, 0)),          # x tile
        _bspec((d_in, h_tile), lambda i, k: (0, k), wbufs),    # w1 tile
        _bspec((1, h_tile), lambda i, k: (0, k), wbufs),       # b1 tile
        _bspec((h_tile, d_out), lambda i, k: (k, 0), wbufs),   # w2 tile
        _bspec((1, d_out), lambda i, k: (0, 0), 1),            # b2     (const index)
        _bspec((1, d_out), lambda i, k: (0, 0), 1),            # gamma  (const index)
        _bspec((1, d_out), lambda i, k: (0, 0), 1),            # beta   (const index)
    ]

    out = pl.pallas_call(
        functools.partial(_mlp_kernel, eps=float(eps),
                          approximate_gelu=bool(approximate_gelu)),
        out_shape=jax.ShapeDtypeStruct((n, d_out), out_dtype),
        grid_spec=pltpu.PrefetchScalarGridSpec(
            num_scalar_prefetch=0,
            grid=grid,
            in_specs=in_specs,
            out_specs=pl.BlockSpec((block_m, d_out), lambda i, k: (i, 0)),
            scratch_shapes=[pltpu.VMEM((block_m, d_out), jnp.float32)],
        ),
        compiler_params=pltpu.CompilerParams(
            dimension_semantics=("parallel", "arbitrary"),  # rows parallel (megacore), hidden reduction
            vmem_limit_bytes=vmem_limit,
        ),
        cost_estimate=cost,
    )(x2, w1c, b1r, w2c, b2r, gr, br)

    return out.reshape(orig_shape[:-1] + (d_out,))


def reference_mlp(x, w1, b1, w2, b2, gamma, beta, eps=1e-6):
    h = x @ w1 + b1
    h = jax.nn.gelu(h, approximate=False)
    y = h @ w2 + b2
    mean = jnp.mean(y, axis=-1, keepdims=True)
    var = jnp.mean((y - mean) ** 2, axis=-1, keepdims=True)
    return (y - mean) / jnp.sqrt(var + eps) * gamma + beta


if __name__ == "__main__":
    # Small shapes consistent with the module's forward: tokens (batch, seq, in_features).
    # Feature dims are multiples of 128 for lane-dense loads/stores.
    batch, seq = 2, 8
    in_features, hidden_features, out_features = 128, 256, 128

    key = jax.random.PRNGKey(0)
    kx, k1, k2, k3, k4, k5, k6 = jax.random.split(key, 7)

    x = jax.random.normal(kx, (batch, seq, in_features), dtype=jnp.float32)

    # Deterministic synthetic parameters (not a checkpoint load).
    w1 = jax.random.normal(k1, (in_features, hidden_features), jnp.float32) * 0.05
    b1 = jax.random.normal(k2, (hidden_features,), jnp.float32) * 0.01
    w2 = jax.random.normal(k3, (hidden_features, out_features), jnp.float32) * 0.05
    b2 = jax.random.normal(k4, (out_features,), jnp.float32) * 0.01
    gamma = 1.0 + 0.1 * jax.random.normal(k5, (out_features,), jnp.float32)
    beta = 0.1 * jax.random.normal(k6, (out_features,), jnp.float32)

    ref = reference_mlp(x, w1, b1, w2, b2, gamma, beta)

    # Path 1: whole-hidden-resident (single reduction step, weights single-buffered).
    out = mlp_pallas(x, w1, b1, w2, b2, gamma, beta)
    out = jax.block_until_ready(out)
    assert out.shape == (batch, seq, out_features)
    assert jnp.allclose(out, ref, atol=1e-4, rtol=1e-4), "mismatch (resident path)"

    # Path 2: streamed hidden tiles (exercises the reduction axis + VMEM accumulator).
    out_tiled = mlp_pallas(x, w1, b1, w2, b2, gamma, beta, hidden_block=128)
    out_tiled = jax.block_until_ready(out_tiled)
    assert jnp.allclose(out_tiled, ref, atol=1e-4, rtol=1e-4), "mismatch (tiled path)"

    print("KERNEL_OK")
</pallas_src>

<mosaic_0001>
module attributes {stable_mosaic.version = 11 : i64} {
  func.func @_mlp_kernel(%arg0: i32, %arg1: i32, %arg2: memref<16x128xf32, #tpu.memory_space<vmem>>, %arg3: memref<128x256xf32, #tpu.memory_space<vmem>>, %arg4: memref<1x256xf32, #tpu.memory_space<vmem>>, %arg5: memref<256x128xf32, #tpu.memory_space<vmem>>, %arg6: memref<1x128xf32, #tpu.memory_space<vmem>>, %arg7: memref<1x128xf32, #tpu.memory_space<vmem>>, %arg8: memref<1x128xf32, #tpu.memory_space<vmem>>, %arg9: memref<16x128xf32, #tpu.memory_space<vmem>>, %arg10: memref<16x128xf32, #tpu.memory_space<vmem>>) attributes {dimension_semantics = [#tpu.dimension_semantics<parallel>, #tpu.dimension_semantics<arbitrary>], iteration_bounds = array<i64: 1, 1>, scalar_prefetch = 0 : i64, scratch_operands = 1 : i64, tpu.core_type = #tpu.core_type<tc>, window_params = [{transform_indices = @transform_0, window_bounds = array<i64: 16, 128>}, {pipeline_mode = #tpu.pipeline_mode<synchronous>, transform_indices = @transform_1, window_bounds = array<i64: 128, 256>}, {pipeline_mode = #tpu.pipeline_mode<synchronous>, transform_indices = @transform_2, window_bounds = array<i64: 1, 256>}, {pipeline_mode = #tpu.pipeline_mode<synchronous>, transform_indices = @transform_3, window_bounds = array<i64: 256, 128>}, {pipeline_mode = #tpu.pipeline_mode<synchronous>, transform_indices = @transform_4, window_bounds = array<i64: 1, 128>}, {pipeline_mode = #tpu.pipeline_mode<synchronous>, transform_indices = @transform_5, window_bounds = array<i64: 1, 128>}, {pipeline_mode = #tpu.pipeline_mode<synchronous>, transform_indices = @transform_6, window_bounds = array<i64: 1, 128>}, {transform_indices = @transform_7, window_bounds = array<i64: 16, 128>}]} {
    %c0_i32 = arith.constant 0 : i32
    %0 = arith.cmpi eq, %arg1, %c0_i32 : i32
    %1 = arith.extui %0 : i1 to i32
    %c0_i32_0 = arith.constant 0 : i32
    %2 = arith.cmpi ne, %1, %c0_i32_0 : i32
    scf.if %2 {
      %cst_18 = arith.constant 0.000000e+00 : f32
      %25 = vector.broadcast %cst_18 : f32 to vector<16x128xf32>
      %c0_19 = arith.constant 0 : index
      %c0_20 = arith.constant 0 : index
      %26 = vector.load %arg10[%c0_19, %c0_20] : memref<16x128xf32, #tpu.memory_space<vmem>>, vector<16x128xf32>
      tpu.vector_store %arg10[%c0_19, %c0_20], %25 {strides = array<i32>} : memref<16x128xf32, #tpu.memory_space<vmem>>, vector<16x128xf32>,
    } else {
    }
    %c0 = arith.constant 0 : index
    %c0_1 = arith.constant 0 : index
    %3 = vector.load %arg2[%c0, %c0_1] : memref<16x128xf32, #tpu.memory_space<vmem>>, vector<16x128xf32>
    %c0_2 = arith.constant 0 : index
    %c0_3 = arith.constant 0 : index
    %4 = vector.load %arg3[%c0_2, %c0_3] : memref<128x256xf32, #tpu.memory_space<vmem>>, vector<128x256xf32>
    %cst = arith.constant dense<0.000000e+00> : vector<16x256xf32>
    %5 = tpu.matmul %3, %4, %cst {dimension_numbers = #tpu.dot_dimension_numbers<[1], [0], [0], [1], [0, 0, 1, 1], [], []>} : vector<16x128xf32>, vector<128x256xf32>, vector<16x256xf32> -> vector<16x256xf32>
    %c0_4 = arith.constant 0 : index
    %c0_5 = arith.constant 0 : index
    %6 = vector.load %arg4[%c0_4, %c0_5] : memref<1x256xf32, #tpu.memory_space<vmem>>, vector<1x256xf32>
    %7 = vector.broadcast %6 : vector<1x256xf32> to vector<16x256xf32>
    %8 = arith.addf %5, %7 : vector<16x256xf32>
    %cst_6 = arith.constant 5.000000e-01 : f32
    %9 = vector.broadcast %cst_6 : f32 to vector<16x256xf32>
    %10 = arith.mulf %9, %8 : vector<16x256xf32>
    %cst_7 = arith.constant 0.707106769 : f32
    %11 = vector.broadcast %cst_7 : f32 to vector<16x256xf32>
    %12 = arith.mulf %8, %11 : vector<16x256xf32>
    %13 = math.erf %12 : vector<16x256xf32>
    %cst_8 = arith.constant 1.000000e+00 : f32
    %14 = vector.broadcast %cst_8 : f32 to vector<16x256xf32>
    %15 = arith.addf %14, %13 : vector<16x256xf32>
    %16 = arith.mulf %10, %15 : vector<16x256xf32>
    %c0_9 = arith.constant 0 : index
    %c0_10 = arith.constant 0 : index
    %17 = vector.load %arg10[%c0_9, %c0_10] : memref<16x128xf32, #tpu.memory_space<vmem>>, vector<16x128xf32>
    %c0_11 = arith.constant 0 : index
    %c0_12 = arith.constant 0 : index
    %18 = vector.load %arg5[%c0_11, %c0_12] : memref<256x128xf32, #tpu.memory_space<vmem>>, vector<256x128xf32>
    %cst_13 = arith.constant dense<0.000000e+00> : vector<16x128xf32>
    %19 = tpu.matmul %16, %18, %cst_13 {dimension_numbers = #tpu.dot_dimension_numbers<[1], [0], [0], [1], [0, 0, 1, 1], [], []>} : vector<16x256xf32>, vector<256x128xf32>, vector<16x128xf32> -> vector<16x128xf32>
    %20 = arith.addf %17, %19 : vector<16x128xf32>
    %c0_14 = arith.constant 0 : index
    %c0_15 = arith.constant 0 : index
    %21 = vector.load %arg10[%c0_14, %c0_15] : memref<16x128xf32, #tpu.memory_space<vmem>>, vector<16x128xf32>
    tpu.vector_store %arg10[%c0_14, %c0_15], %20 {strides = array<i32>} : memref<16x128xf32, #tpu.memory_space<vmem>>, vector<16x128xf32>,
    %c0_i32_16 = arith.constant 0 : i32
    %22 = arith.cmpi eq, %arg1, %c0_i32_16 : i32
    %23 = arith.extui %22 : i1 to i32
    %c0_i32_17 = arith.constant 0 : i32
    %24 = arith.cmpi ne, %23, %c0_i32_17 : i32
    scf.if %24 {
      %c0_18 = arith.constant 0 : index
      %c0_19 = arith.constant 0 : index
      %25 = vector.load %arg10[%c0_18, %c0_19] : memref<16x128xf32, #tpu.memory_space<vmem>>, vector<16x128xf32>
      %c0_20 = arith.constant 0 : index
      %c0_21 = arith.constant 0 : index
      %26 = vector.load %arg6[%c0_20, %c0_21] : memref<1x128xf32, #tpu.memory_space<vmem>>, vector<1x128xf32>
      %27 = vector.broadcast %26 : vector<1x128xf32> to vector<16x128xf32>
      %28 = arith.addf %25, %27 : vector<16x128xf32>
      %cst_22 = arith.constant dense<0.000000e+00> : vector<16xf32>
      %29 = vector.multi_reduction <add>, %28, %cst_22 [1] : vector<16x128xf32> to vector<16xf32>
      %30 = vector.shape_cast %29 : vector<16xf32> to vector<16x1xf32>
      %cst_23 = arith.constant 1.280000e+02 : f32
      %31 = vector.broadcast %cst_23 : f32 to vector<16x1xf32>
      %32 = arith.divf %30, %31 : vector<16x1xf32>
      %33 = vector.broadcast %32 : vector<16x1xf32> to vector<16x128xf32>
      %34 = arith.subf %28, %33 : vector<16x128xf32>
      %35 = arith.mulf %34, %34 : vector<16x128xf32>
      %cst_24 = arith.constant dense<0.000000e+00> : vector<16xf32>
      %36 = vector.multi_reduction <add>, %35, %cst_24 [1] : vector<16x128xf32> to vector<16xf32>
      %37 = vector.shape_cast %36 : vector<16xf32> to vector<16x1xf32>
      %cst_25 = arith.constant 1.280000e+02 : f32
      %38 = vector.broadcast %cst_25 : f32 to vector<16x1xf32>
      %39 = arith.divf %37, %38 : vector<16x1xf32>
      %cst_26 = arith.constant 9.99999997E-7 : f32
      %40 = vector.broadcast %cst_26 : f32 to vector<16x1xf32>
      %41 = arith.addf %39, %40 : vector<16x1xf32>
      %42 = math.rsqrt %41 : vector<16x1xf32>
      %43 = vector.broadcast %42 : vector<16x1xf32> to vector<16x128xf32>
      %44 = arith.mulf %34, %43 : vector<16x128xf32>
      %c0_27 = arith.constant 0 : index
      %c0_28 = arith.constant 0 : index
      %45 = vector.load %arg7[%c0_27, %c0_28] : memref<1x128xf32, #tpu.memory_space<vmem>>, vector<1x128xf32>
      %46 = vector.broadcast %45 : vector<1x128xf32> to vector<16x128xf32>
      %47 = arith.mulf %44, %46 : vector<16x128xf32>
      %c0_29 = arith.constant 0 : index
      %c0_30 = arith.constant 0 : index
      %48 = vector.load %arg8[%c0_29, %c0_30] : memref<1x128xf32, #tpu.memory_space<vmem>>, vector<1x128xf32>
      %49 = vector.broadcast %48 : vector<1x128xf32> to vector<16x128xf32>
      %50 = arith.addf %47, %49 : vector<16x128xf32>
      %c0_31 = arith.constant 0 : index
      %c0_32 = arith.constant 0 : index
      %51 = vector.load %arg9[%c0_31, %c0_32] : memref<16x128xf32, #tpu.memory_space<vmem>>, vector<16x128xf32>
      tpu.vector_store %arg9[%c0_31, %c0_32], %50 {strides = array<i32>} : memref<16x128xf32, #tpu.memory_space<vmem>>, vector<16x128xf32>,
    } else {
    }
    return
  }
  func.func @transform_0(%arg0: i32, %arg1: i32) -> (i32, i32) {
    %c0_i32 = arith.constant 0 : i32
    %c0_i32_0 = arith.constant 0 : i32
    return %arg0, %c0_i32 : i32, i32
  }
  func.func @transform_1(%arg0: i32, %arg1: i32) -> (i32, i32) {
    %c0_i32 = arith.constant 0 : i32
    %c0_i32_0 = arith.constant 0 : i32
    return %c0_i32, %arg1 : i32, i32
  }
  func.func @transform_2(%arg0: i32, %arg1: i32) -> (i32, i32) {
    %c0_i32 = arith.constant 0 : i32
    %c0_i32_0 = arith.constant 0 : i32
    return %c0_i32, %arg1 : i32, i32
  }
  func.func @transform_3(%arg0: i32, %arg1: i32) -> (i32, i32) {
    %c0_i32 = arith.constant 0 : i32
    %c0_i32_0 = arith.constant 0 : i32
    return %arg1, %c0_i32 : i32, i32
  }
  func.func @transform_4(%arg0: i32, %arg1: i32) -> (i32, i32) {
    %c0_i32 = arith.constant 0 : i32
    %c0_i32_0 = arith.constant 0 : i32
    %c0_i32_1 = arith.constant 0 : i32
    return %c0_i32, %c0_i32_0 : i32, i32
  }
  func.func @transform_5(%arg0: i32, %arg1: i32) -> (i32, i32) {
    %c0_i32 = arith.constant 0 : i32
    %c0_i32_0 = arith.constant 0 : i32
    %c0_i32_1 = arith.constant 0 : i32
    return %c0_i32, %c0_i32_0 : i32, i32
  }
  func.func @transform_6(%arg0: i32, %arg1: i32) -> (i32, i32) {
    %c0_i32 = arith.constant 0 : i32
    %c0_i32_0 = arith.constant 0 : i32
    %c0_i32_1 = arith.constant 0 : i32
    return %c0_i32, %c0_i32_0 : i32, i32
  }
  func.func @transform_7(%arg0: i32, %arg1: i32) -> (i32, i32) {
    %c0_i32 = arith.constant 0 : i32
    %c0_i32_0 = arith.constant 0 : i32
    return %arg0, %c0_i32 : i32, i32
  }
}

</mosaic_0001>

<bundles_post_ra>
// kernel: tpu_custom_call.1
= control target key start
LH: loop header
LB: loop body
LE: loop exit
PB: predicated region body
PF: predicated region fallthrough
CT: control target
= control target key end

     0   :  { %12 = vsyncpa [#allocation4], 0  ;;  %s637_s0 = inlined_call_operand.hbm [shape: f32[16,128], index: 0, kind: input, shape index: {}]   ;;  %s638_s1 = inlined_call_operand.hbm [shape: f32[128,256], index: 1, kind: input, shape index: {}]   ;;  %s639_s2 = inlined_call_operand.vmem [shape: f32[1,256], index: 2, kind: input, shape index: {}]   ;;  %s640_s3 = inlined_call_operand.hbm [shape: f32[256,128], index: 3, kind: input, shape index: {}]   ;;  %s641_s4 = inlined_call_operand.vmem [shape: f32[1,128], index: 4, kind: input, shape index: {}]   ;;  %s642_s5 = inlined_call_operand.vmem [shape: f32[1,128], index: 5, kind: input, shape index: {}]   ;;  %s643_s6 = inlined_call_operand.vmem [shape: f32[1,128], index: 6, kind: input, shape index: {}]   ;;  %s644_s7 = inlined_call_operand.hbm [shape: f32[16,128], index: 7, kind: output, shape index: {}]  }
   0x1   :  { %13 = vsyncpa [#allocation7], 0 }
   0x2   :  { %14 = vsyncpa [#allocation5], 0  ;;  %s553_s24 = smov [#allocation6]  }
   0x3   :  { %s32_s25 = sshll.u32 %s553_s24, 4  ;;  %s33_s25 = int_to_ptr.vmem [resolvable:$true] %s32_s25 }
   0x4   :  { %s475_s26 = scalar_lea.vmem %s33_s25, 4096  ;;  %p480_p1 = scmp.lt.s32.totalorder %s33_s25, %s33_s25 }
   0x5   :  { %p476_p0 = scmp.ne.s32.totalorder %s33_s25, %s475_s26  ;;  %p481_p2 = scmp.lt.s32.totalorder %s475_s26, %s475_s26 }
   0x7   :  { %p482_p3 = por %p481_p2, %p480_p1 }
   0x9   :  { %p483_p4 = pnand %p482_p3, %p476_p0 }
   0xb   :  { %486 = shalt.err (!%p483_p4)
}
   0xc   :  { %s554_s27 = smov 256   ;;  %s555_s28 = smov 16  }
   0xd   :  { %38 = dma.hbm_to_vmem [thread:$0]  %s638_s1, 4096, %s33_s25, [#allocation7], %s554_s27, %s554_s27, %s555_s28  }
   0xe   :  { %s556_s8 = smov [#allocation3]  }
   0xf   :  { %s20_s9 = sshll.u32 %s556_s8, 4  ;;  %s21_s9 = int_to_ptr.vmem [resolvable:$true] %s20_s9 }
  0x10   :  { %s495_s10 = scalar_lea.vmem %s21_s9, 256  ;;  %p500_p6 = scmp.lt.s32.totalorder %s21_s9, %s21_s9 }
  0x11   :  { %p496_p5 = scmp.ne.s32.totalorder %s21_s9, %s495_s10  ;;  %p501_p7 = scmp.lt.s32.totalorder %s495_s10, %s495_s10 }
  0x13   :  { %p502_p8 = por %p501_p7, %p500_p6 }
  0x15   :  { %p503_p9 = pnand %p502_p8, %p496_p5 }
  0x17   :  { %506 = shalt.err (!%p503_p9)
}
  0x18   :  { %s557_s11 = smov 128   ;;  %s558_s12 = smov 8  }
  0x19   :  { %26 = dma.hbm_to_vmem [thread:$0]  %s637_s0, 256, %s21_s9, [#allocation4], %s557_s11, %s557_s11, %s558_s12  }
  0x1a   :  { %s559_s1 = smov [#allocation8]  }
  0x1b   :  { %s46_s15 = sshll.u32 %s559_s1, 4  ;;  %s47_s15 = int_to_ptr.vmem [resolvable:$true] %s46_s15 }
  0x1c   :  { %s515_s16 = scalar_lea.vmem %s47_s15, 4096  ;;  %p520_p11 = scmp.lt.s32.totalorder %s47_s15, %s47_s15 }
  0x1d   :  { %p516_p10 = scmp.ne.s32.totalorder %s47_s15, %s515_s16  ;;  %p521_p12 = scmp.lt.s32.totalorder %s515_s16, %s515_s16 }
  0x1f   :  { %p522_p13 = por %p521_p12, %p520_p11 }
  0x21   :  { %p523_p0 = pnand %p522_p13, %p516_p10 }
  0x23   :  { %526 = shalt.err (!%p523_p0)
}
  0x24   :  { %52 = dma.hbm_to_vmem [thread:$0]  %s640_s3, 4096, %s47_s15, [#allocation7], %s557_s11, %s557_s11, %s558_s12  }
  0x25   :  { %547 = dma.done.wait [#allocation4], 256  }
  0x26   :  { %548 = vsyncadd [#allocation4], 4294967040 }
  0x27   :  { %549 = dma.done.wait [#allocation7], 8192  }
  0x28   :  { %550 = vsyncadd [#allocation7], 4294959104  ;;  %v560_v0 = vmov 0.0   ;;  %v107_v1 = vld [vmem:[#allocation6 + $0xf8] sm:$0xff]  ;;  %v106_v2 = vld [vmem:[#allocation6 + $0xf0] sm:$0xff]  ;;  %s561_s23 = smov [#allocation9]  }
  0x29   :  { %184 = vmatprep.mubr.f32.mxu0 %v560_v0  ;;  %v105_v3 = vld [vmem:[#allocation6 + $0xe8] sm:$0xff]  ;;  %120 = vmatprep.subr.mxu0 %v107_v1  ;;  %v104_v4 = vld [vmem:[#allocation6 + $0xe0] sm:$0xff]  ;;  %v103_v5 = vld [vmem:[#allocation6 + $0xd8] sm:$0xff]  ;;  %s392_s24 = sshll.u32 %s561_s23, 4  ;;  %s393_s24 = int_to_ptr.vmem [resolvable:$true] %s392_s24 }
  0x2a   :  { %121 = vmatpush1.msra.mxu0 %v106_v2  ;;  %v102_v6 = vld [vmem:[#allocation6 + $0xd0] sm:$0xff]  ;;  %v101_v7 = vld [vmem:[#allocation6 + $0xc8] sm:$0xff]  ;;  %v100_v8 = vld [vmem:[#allocation6 + $0xc0] sm:$0xff]  ;;  %s527_s25 = scalar_lea.vmem %s393_s24, 256  ;;  %p532_p2 = scmp.lt.s32.totalorder %s393_s24, %s393_s24 }
  0x2b   :  { %122 = vmatprep.subr.mxu0 %v105_v3  ;;  %v99_v9 = vld [vmem:[#allocation6 + $0xb8] sm:$0xff]  ;;  %v98_v10 = vld [vmem:[#allocation6 + $0xb0] sm:$0xff]  ;;  %v97_v11 = vld [vmem:[#allocation6 + $0xa8] sm:$0xff]  ;;  %v110_v3 = vlaneseq  ;;  %p528_p1 = scmp.ne.s32.totalorder %s393_s24, %s527_s25  ;;  %p533_p3 = scmp.lt.s32.totalorder %s527_s25, %s527_s25 }
  0x2c   :  { %123 = vmatpush1.msra.mxu0 %v104_v4  ;;  %v96_v12 = vld [vmem:[#allocation6 + $0xa0] sm:$0xff]  ;;  %v95_v13 = vld [vmem:[#allocation6 + $0x98] sm:$0xff]  ;;  %v94_v14 = vld [vmem:[#allocation6 + $0x90] sm:$0xff] }
  0x2d   :  { %124 = vmatprep.subr.mxu0 %v103_v5  ;;  %v250_v15 = vld [vmem:[#allocation8 + $0xf8] sm:$0xff]  ;;  %v93_v17 = vld [vmem:[#allocation6 + $0x88] sm:$0xff]  ;;  %v249_v18 = vld [vmem:[#allocation8 + $0xf0] sm:$0xff]  ;;  %v111_v4 = vshrl.u32 %v110_v3, 7  ;;  %p534_p4 = por %p533_p3, %p532_p2 }
  0x2e   :  { %125 = vmatpush1.msra.mxu0 %v102_v6  ;;  %v234_v16 = vld [vmem:[#allocation8 + $0x78] sm:$0xff]  ;;  %408 = vmatprep.subr.mxu1 %v250_v15  ;;  %v233_v19 = vld [vmem:[#allocation8 + $0x70] sm:$0xff]  ;;  %v92_v20 = vld [vmem:[#allocation6 + $0x80] sm:$0xff] }
  0x2f   :  { %126 = vmatprep.subr.mxu0 %v101_v7  ;;  %409 = vmatpush3.msra.mxu1 %v234_v16  ;;  %v248_v21 = vld [vmem:[#allocation8 + $0xe8] sm:$0xff]  ;;  %v91_v22 = vld [vmem:[#allocation6 + $0x78] sm:$0xff]  ;;  %v90_v24 = vld [vmem:[#allocation6 + $0x70] sm:$0xff]  ;;  %v112_v5 = vsub.s32 0, %v111_v4  ;;  %v116_v7 = vsub.s32 1, %v111_v4  ;;  %p535_p5 = pnand %p534_p4, %p528_p1 }
  0x30   :  { %127 = vmatpush1.msra.mxu0 %v100_v8  ;;  %410 = vmatprep.subr.mxu1 %v249_v18  ;;  %v232_v23 = vld [vmem:[#allocation8 + $0x68] sm:$0xff]  ;;  %v88_v26 = vld [vmem:[#allocation6 + $0x60] sm:$0xff]  ;;  %v87_v27 = vld [vmem:[#allocation6 + $0x58] sm:$0xff] }
  0x31   :  { %128 = vmatprep.subr.mxu0 %v99_v9  ;;  %411 = vmatpush3.msra.mxu1 %v233_v19  ;;  %v89_v25 = vld [vmem:[#allocation6 + $0x68] sm:$0xff]  ;;  %v86_v28 = vld [vmem:[#allocation6 + $0x50] sm:$0xff]  ;;  %v84_v30 = vld [vmem:[#allocation6 + $0x40] sm:$0xff] }
  0x32   :  { %129 = vmatpush1.msra.mxu0 %v98_v10  ;;  %412 = vmatprep.subr.mxu1 %v248_v21  ;;  %v85_v29 = vld [vmem:[#allocation6 + $0x48] sm:$0xff]  ;;  %v83_v31 = vld [vmem:[#allocation6 + $0x38] sm:$0xff]  ;;  %v82_v32 = vld [vmem:[#allocation6 + $0x30] sm:$0xff] }
  0x33   :  { %130 = vmatprep.subr.mxu0 %v97_v11  ;;  %413 = vmatpush3.msra.mxu1 %v232_v23  ;;  %v81_v33 = vld [vmem:[#allocation6 + $0x28] sm:$0xff]  ;;  %v80_v34 = vld [vmem:[#allocation6 + $0x20] sm:$0xff]  ;;  %v79_v35 = vld [vmem:[#allocation6 + $0x18] sm:$0xff] }
  0x34   :  { %131 = vmatpush1.msra.mxu0 %v96_v12  ;;  %v78_v36 = vld [vmem:[#allocation6 + $0x10] sm:$0xff]  ;;  %v77_v37 = vld [vmem:[#allocation6 + $0x8] sm:$0xff]  ;;  %v76_v38 = vld [vmem:[#allocation6] sm:$0xff] }
  0x35   :  { %132 = vmatprep.subr.mxu0 %v95_v13  ;;  %v74_v39 = vld [vmem:[#allocation3] sm:$0xff]  ;;  %v75_v40 = vld [vmem:[#allocation3 + $0x8] sm:$0xff]  ;;  %v247_v41 = vld [vmem:[#allocation8 + $0xe0] sm:$0xff] }
  0x36   :  { %133 = vmatpush1.msra.mxu0 %v94_v14  ;;  %414 = vmatprep.subr.mxu1 %v247_v41  ;;  %v231_v42 = vld [vmem:[#allocation8 + $0x60] sm:$0xff]  ;;  %v246_v43 = vld [vmem:[#allocation8 + $0xd8] sm:$0xff]  ;;  %v245_v45 = vld [vmem:[#allocation8 + $0xd0] sm:$0xff] }
  0x37   :  { %134 = vmatprep.subr.mxu0 %v93_v17  ;;  %415 = vmatpush3.msra.mxu1 %v231_v42  ;;  %v230_v44 = vld [vmem:[#allocation8 + $0x58] sm:$0xff]  ;;  %v229_v46 = vld [vmem:[#allocation8 + $0x50] sm:$0xff]  ;;  %v244_v47 = vld [vmem:[#allocation8 + $0xc8] sm:$0xff] }
  0x38   :  { %135 = vmatpush1.msra.mxu0 %v92_v20  ;;  %416 = vmatprep.subr.mxu1 %v246_v43  ;;  %v228_v48 = vld [vmem:[#allocation8 + $0x48] sm:$0xff]  ;;  %v243_v49 = vld [vmem:[#allocation8 + $0xc0] sm:$0xff]  ;;  %v242_v51 = vld [vmem:[#allocation8 + $0xb8] sm:$0xff] }
  0x39   :  { %136 = vmatprep.subr.mxu0 %v91_v22  ;;  %417 = vmatpush3.msra.mxu1 %v230_v44  ;;  %v227_v50 = vld [vmem:[#allocation8 + $0x40] sm:$0xff]  ;;  %v226_v52 = vld [vmem:[#allocation8 + $0x38] sm:$0xff]  ;;  %v241_v53 = vld [vmem:[#allocation8 + $0xb0] sm:$0xff] }
  0x3a   :  { %137 = vmatpush1.msra.mxu0 %v90_v24  ;;  %418 = vmatprep.subr.mxu1 %v245_v45  ;;  %v225_v54 = vld [vmem:[#allocation8 + $0x30] sm:$0xff]  ;;  %v240_v55 = vld [vmem:[#allocation8 + $0xa8] sm:$0xff]  ;;  %v239_v57 = vld [vmem:[#allocation8 + $0xa0] sm:$0xff] }
  0x3b   :  { %138 = vmatprep.subr.mxu0 %v89_v25  ;;  %419 = vmatpush3.msra.mxu1 %v229_v46  ;;  %v224_v56 = vld [vmem:[#allocation8 + $0x28] sm:$0xff]  ;;  %v223_v58 = vld [vmem:[#allocation8 + $0x20] sm:$0xff]  ;;  %v238_v59 = vld [vmem:[#allocation8 + $0x98] sm:$0xff] }
  0x3c   :  { %139 = vmatpush1.msra.mxu0 %v88_v26  ;;  %420 = vmatprep.subr.mxu1 %v244_v47  ;;  %v222_v60 = vld [vmem:[#allocation8 + $0x18] sm:$0xff]  ;;  %v237_v61 = vld [vmem:[#allocation8 + $0x90] sm:$0xff]  ;;  %v236_v63 = vld [vmem:[#allocation8 + $0x88] sm:$0xff] }
  0x3d   :  { %140 = vmatprep.subr.mxu0 %v87_v27  ;;  %421 = vmatpush3.msra.mxu1 %v228_v48  ;;  %v221_v62 = vld [vmem:[#allocation8 + $0x10] sm:$0xff]  ;;  %v235_v1 = vld [vmem:[#allocation8 + $0x80] sm:$0xff] }
  0x3e   :  { %141 = vmatpush1.msra.mxu0 %v86_v28  ;;  %422 = vmatprep.subr.mxu1 %v243_v49  ;;  %v219_v2 = vld [vmem:[#allocation8] sm:$0xff]  ;;  %v108_v6 = vld [vmem:[%s639_s2] sm:$0x3] }
  0x3f   :  { %142 = vmatprep.subr.mxu0 %v85_v29  ;;  %423 = vmatpush3.msra.mxu1 %v227_v50  ;;  %v113_v8 = vrot.slane %v108_v6, %v112_v5  ;;  %v117_v9 = vrot.slane %v108_v6, %v116_v7 }
  0x40   :  { %143 = vmatpush1.msra.mxu0 %v84_v30  ;;  %424 = vmatprep.subr.mxu1 %v242_v51 }
  0x41   :  { %144 = vmatprep.subr.mxu0 %v83_v31  ;;  %425 = vmatpush3.msra.mxu1 %v226_v52 }
  0x42   :  { %145 = vmatpush1.msra.mxu0 %v82_v32  ;;  %426 = vmatprep.subr.mxu1 %v241_v53 }
  0x43   :  { %146 = vmatprep.subr.mxu0 %v81_v33  ;;  %427 = vmatpush3.msra.mxu1 %v225_v54 }
  0x44   :  { %147 = vmatpush1.msra.mxu0 %v80_v34  ;;  %428 = vmatprep.subr.mxu1 %v240_v55 }
  0x45   :  { %148 = vmatprep.subr.mxu0 %v79_v35  ;;  %429 = vmatpush3.msra.mxu1 %v224_v56 }
  0x46   :  { %149 = vmatpush1.msra.mxu0 %v78_v36  ;;  %430 = vmatprep.subr.mxu1 %v239_v57 }
  0x47   :  { %150 = vmatprep.subr.mxu0 %v77_v37  ;;  %431 = vmatpush3.msra.mxu1 %v223_v58 }
  0x48   :  { %151 = vmatpush1.msra.mxu0 %v76_v38  ;;  %432 = vmatprep.subr.mxu1 %v238_v59 }
  0x49   :  { %185 = vmatmul.mubr.f32.vlgmr.msra.gmra.mxu0 %v74_v39  ;;  %433 = vmatpush3.msra.mxu1 %v222_v60 }
  0x4a   :  { %190 = vmatprep.mubr.f32.mxu0 %v560_v0  ;;  %434 = vmatprep.subr.mxu1 %v237_v61  ;;  %v220_v0 = vld [vmem:[#allocation8 + $0x8] sm:$0xff] }
  0x4b   :  { %435 = vmatpush3.msra.mxu1 %v221_v62  ;;  %v406_v62 = vld [vmem:[%s642_s5] ss:$0 sm:$0xff] }
  0x4c   :  { %436 = vmatprep.subr.mxu1 %v236_v63 }
  0x4d   :  { %191 = vmatmul.mubr.f32.gmra.mxu0 %v75_v40  ;;  %437 = vmatpush3.msra.mxu1 %v220_v0  ;;  %v405_v40 = vld [vmem:[%s641_s4] ss:$0 sm:$0xff] }
  0x4e   :  { %438 = vmatprep.subr.mxu1 %v235_v1  ;;  %v407_v0 = vld [vmem:[%s643_s6] ss:$0 sm:$0xff] }
  0x4f   :  { %439 = vmatpush3.msra.mxu1 %v219_v2 }
 0x109   :  { %v186_v10 = vpop.f32.mrf.mxu0 }
 0x10a   :  { %v187_v11 = vadd.f32 %v186_v10, %v113_v8 }
 0x10b   :  { %v188_v12 = vpop.f32.mrf.mxu0 }
 0x10c   :  { %v201_v13 = vmul.f32 0.70710677, %v187_v11  ;;  %v189_v14 = vadd.f32 %v188_v12, %v117_v9  ;;  %v197_v28 = vmul.f32 0.5, %v187_v11 }
 0x10d   :  { %v192_v15 = vpop.f32.mrf.mxu0 }
 0x10e   :  { %455 = verf.f32 %v201_v13  ;;  %v202_v16 = vmul.f32 0.70710677, %v189_v14  ;;  %v193_v17 = vadd.f32 %v192_v15, %v113_v8  ;;  %v198_v25 = vmul.f32 0.5, %v189_v14 }
 0x10f   :  { %v194_v18 = vpop.f32.mrf.mxu0 }
 0x110   :  { %457 = verf.f32 %v202_v16  ;;  %v203_v19 = vmul.f32 0.70710677, %v193_v17  ;;  %v195_v20 = vadd.f32 %v194_v18, %v117_v9  ;;  %v199_v35 = vmul.f32 0.5, %v193_v17 }
 0x112   :  { %459 = verf.f32 %v203_v19  ;;  %v204_v21 = vmul.f32 0.70710677, %v195_v20  ;;  %v200_v33 = vmul.f32 0.5, %v195_v20 }
 0x114   :  { %461 = verf.f32 %v204_v21 }
 0x11b   :  { %v456_v22 = vpop.eup %455 }
 0x11c   :  { %v209_v24 = vadd.f32 1.0, %v456_v22 }
 0x11d   :  { %v458_v23 = vpop.eup %457 }
 0x11e   :  { %v210_v26 = vadd.f32 1.0, %v458_v23  ;;  %v213_v31 = vmul.f32 %v209_v24, %v197_v28 }
 0x11f   :  { %v460_v27 = vpop.eup %459 }
 0x120   :  { %v214_v29 = vmul.f32 %v210_v26, %v198_v25  ;;  %v211_v32 = vadd.f32 1.0, %v460_v27 }
 0x121   :  { %v462_v30 = vpop.eup %461 }
 0x122   :  { %315 = vmatprep.mubr.f32.mxu1 %v214_v29  ;;  %v212_v34 = vadd.f32 1.0, %v462_v30  ;;  %v215_v37 = vmul.f32 %v211_v32, %v199_v35 }
 0x123   :  { %316 = vmatmul.mubr.f32.vlgmr.msra.gmra.mxu1 %v213_v31 }
 0x124   :  { %v216_v36 = vmul.f32 %v212_v34, %v200_v33 }
 0x126   :  { %320 = vmatprep.mubr.f32.mxu1 %v216_v36 }
 0x127   :  { %321 = vmatmul.mubr.f32.gmra.mxu1 %v215_v37 }
 0x1e3   :  { %v440_v38 = vpop.f32.mrf.mxu1 }
 0x1e5   :  { %v441_v39 = vpop.f32.mrf.mxu1 }
 0x1e6   :  { %v442_v41 = vadd.f32 %v441_v39, %v440_v38 }
 0x1e7   :  { %v443_v42 = vpop.f32.mrf.mxu1 }
 0x1e8   :  { %v342_v43 = vadd.f32 %v442_v41, %v405_v40 }
 0x1e9   :  { %v444_v44 = vpop.f32.mrf.mxu1 }
 0x1ea   :  { %v445_v45 = vadd.f32 %v444_v44, %v443_v42  ;;  %344 = vadd.xlane.f32.xlu0 %v342_v43 }
 0x1ec   :  { %v343_v46 = vadd.f32 %v445_v45, %v405_v40 }
 0x1ee   :  { %346 = vadd.xlane.f32.xlu0 %v343_v46 }
 0x273   :  { %v345_v47 = vpop.xlane.xlu0 %344 }
 0x274   :  { %v349_v48 = vmul.f32 0.0078125, %v345_v47 }
 0x276   :  { %v351_v49 = vsub.f32 %v342_v43, %v349_v48 }
 0x277   :  { %v347_v50 = vpop.xlane.xlu0 %346 }
 0x278   :  { %v350_v51 = vmul.f32 0.0078125, %v347_v50  ;;  %v353_v52 = vmul.f32 %v351_v49, %v351_v49 }
 0x27a   :  { %v352_v53 = vsub.f32 %v343_v46, %v350_v51  ;;  %355 = vadd.xlane.f32.xlu1 %v353_v52 }
 0x27c   :  { %v354_v54 = vmul.f32 %v352_v53, %v352_v53 }
 0x27e   :  { %357 = vadd.xlane.f32.xlu1 %v354_v54 }
 0x303   :  { %v356_v55 = vpop.xlane.xlu1 %355 }
 0x304   :  { %v359_v56 = vmul.f32 0.0078125, %v356_v55 }
 0x306   :  { %v361_v57 = vadd.f32 1e-06, %v359_v56 }
 0x307   :  { %v358_v58 = vpop.xlane.xlu1 %357 }
 0x308   :  { %463 = vrsqrt.f32 %v361_v57  ;;  %v360_v59 = vmul.f32 0.0078125, %v358_v58 }
 0x30a   :  { %v362_v60 = vadd.f32 1e-06, %v360_v59 }
 0x30c   :  { %465 = vrsqrt.f32 %v362_v60 }
 0x315   :  { %v464_v61 = vpop.eup %463 }
 0x316   :  { %v365_v63 = vmul.f32 %v464_v61, %v351_v49 }
 0x318   :  { %v374_v1 = vmul.f32 %v406_v62, %v365_v63 }
 0x319   :  { %v466_v2 = vpop.eup %465 }
 0x31a   :  { %v366_v3 = vmul.f32 %v466_v2, %v352_v53  ;;  %v383_v4 = vadd.f32 %v407_v0, %v374_v1 }
 0x31c   :  { %v375_v5 = vmul.f32 %v406_v62, %v366_v3  ;;  %385 = vst [vmem:[#allocation9] sm:$0xff] %v383_v4 }
 0x31e   :  { %v384_v6 = vadd.f32 %v407_v0, %v375_v5 }
 0x320   :  { %386 = vst [vmem:[#allocation9 + $0x8] sm:$0xff] %v384_v6 }
 0x321   :  { %538 = shalt.err (!%p535_p5)
}
 0x322   :  { %398 = dma.vmem_to_hbm [thread:$0]  %s393_s24, 256, %s644_s7, [#allocation5], %s557_s11, %s557_s11, %s558_s12  }
 0x323   :  { %551 = dma.done.wait [#allocation5], 256  }
 0x324   :  { %552 = vsyncadd [#allocation5], 4294967040 }
 0x325   :  { %402 = vsyncpa [#allocation4], 1 }
 0x326   :  { %403 = vsyncpa [#allocation7], 1 }
 0x327   :  { %404 = vsyncpa [#allocation5], 1 }

</bundles_post_ra>
